<compile_context>
chip_gen: v7x
topology: tpu7x:2x2x1
jax: 0.10.0
libtpu: 0.0.40
codegen_flags: <defaults>
</compile_context>

<pallas_src>
import functools

import jax
import jax.numpy as jnp
from jax.experimental import pallas as pl
from jax.experimental.pallas import tpu as pltpu

C = 64  # channel count fixed by the module definition (Conv2d(64, 64, 1))


def _modulation_kernel(x_ref, y_ref, w0_ref, w1_ref, b_ref, o_ref):
    # x_ref / y_ref / o_ref : (C, ts)  f32   channel-major tile, spatial on lanes
    # w0_ref                : (2C, C)  bf16  rows [0:C)=scale_conv0, [C:2C)=shift_conv0
    # w1_ref                : (2C, 2C) bf16  block-diag of scale_conv1 / shift_conv1
    # b_ref                 : (2, 2C, 1) f32 layer-0 / layer-1 biases
    #                                        (scale half of layer-1 bias has +1 folded in)
    x = x_ref[...]
    y = y_ref[...]

    # Fused first layer: bf16 MXU matmul, f32 accumulation, f32 bias.
    h = jnp.dot(w0_ref[...], y.astype(jnp.bfloat16),
                preferred_element_type=jnp.float32) + b_ref[0]
    h = jnp.maximum(h, 0.1 * h)  # leaky_relu(0.1)

    # Fused (block-diagonal) second layer: (2C,2C) @ (2C,ts) -> (2C,ts).
    z = jnp.dot(w1_ref[...], h.astype(jnp.bfloat16),
                preferred_element_type=jnp.float32) + b_ref[1]

    scale = z[:C, :]   # static sublane slices; 64 is 8-aligned -> free
    shift = z[C:, :]   # (+1 already folded into the scale-path bias)
    o_ref[...] = (x * scale + shift).astype(o_ref.dtype)


def pack_params(p):
    """Pack raw per-conv params into the fused layout the kernel consumes.

    Conv weights are PyTorch-style (out, in); in the channel-major (C, ts)
    layout a 1x1 conv is W @ y + b[:, None].  Weights go to bf16 for the MXU;
    biases stay f32.  The module's `+1` is folded into the scale-path bias.
    Call this ONCE (outside the hot path) and pass the results to the kernel.
    """
    w0 = jnp.concatenate([p["w_sc0"], p["w_sh0"]], axis=0)                 # (2C, C)
    w1 = jnp.zeros((2 * C, 2 * C), jnp.float32)
    w1 = w1.at[:C, :C].set(p["w_sc1"]).at[C:, C:].set(p["w_sh1"])          # (2C, 2C)
    b0 = jnp.concatenate([p["b_sc0"], p["b_sh0"]])[:, None]                # (2C, 1)
    b1 = jnp.concatenate([p["b_sc1"] + 1.0, p["b_sh1"]])[:, None]          # (2C, 1)
    b = jnp.stack([b0, b1], axis=0)                                        # (2, 2C, 1)
    return w0.astype(jnp.bfloat16), w1.astype(jnp.bfloat16), b


def _pick_spatial_tile(HW, N, ts_max):
    """Lane-axis tile: full extent if tiny, else a multiple of 128, sized so the
    total grid has >=4 steps when possible (keeps both v7x TensorCores busy)."""
    if HW <= 128:
        return HW  # cannot legally split below one full 128-lane tile
    ts = (min(ts_max, HW) // 128) * 128
    min_total_steps = 4
    want_spatial = pl.cdiv(min_total_steps, N)
    if pl.cdiv(HW, ts) < want_spatial:
        ts_split = pl.cdiv(pl.cdiv(HW, want_spatial), 128) * 128
        ts = max(128, min(ts, ts_split))
    return ts


@functools.partial(jax.jit, static_argnames=("ts",))
def modulation_pallas(x_nchw, y_nchw, w0, w1, b, *, ts=8192):
    """x_nchw, y_nchw: (N, 64, H, W) float32.  w0/w1/b: outputs of pack_params."""
    N, Cc, H, W = x_nchw.shape
    assert Cc == C and y_nchw.shape == x_nchw.shape
    HW = H * W

    # NCHW -> (N, C, H*W): contiguous reshape, zero data movement.
    x3 = x_nchw.reshape(N, C, HW)
    y3 = y_nchw.reshape(N, C, HW)

    tile = _pick_spatial_tile(HW, N, ts)
    grid = (N, pl.cdiv(HW, tile))  # partial tail tile handled by Pallas OOB masking
                                   # (the op is per-column, so padding is harmless)

    data_spec = pl.BlockSpec((None, C, tile), lambda n, i: (n, 0, i))
    w0_spec = pl.BlockSpec((2 * C, C), lambda n, i: (0, 0))
    w1_spec = pl.BlockSpec((2 * C, 2 * C), lambda n, i: (0, 0))
    b_spec = pl.BlockSpec((2, 2 * C, 1), lambda n, i: (0, 0, 0))

    out3 = pl.pallas_call(
        _modulation_kernel,
        out_shape=jax.ShapeDtypeStruct((N, C, HW), x_nchw.dtype),
        grid_spec=pltpu.PrefetchScalarGridSpec(
            num_scalar_prefetch=0,
            grid=grid,
            in_specs=[data_spec, data_spec, w0_spec, w1_spec, b_spec],
            out_specs=data_spec,
        ),
        compiler_params=pltpu.CompilerParams(
            dimension_semantics=("parallel", "parallel"),
            # ~22 MiB footprint at ts=8192 (f32 I/O); raise scoped VMEM so the
            # big tile also works on v5e's 16 MiB default, stays < v7x physical.
            vmem_limit_bytes=40 << 20,
        ),
    )(x3, y3, w0, w1, b)

    return out3.reshape(N, C, H, W)


def init_params(key):
    """Deterministic synthetic params, PyTorch layout: conv weight (out, in)
    (the trailing 1x1 of a Conv2d kernel is dropped), bias (out,)."""
    ks = jax.random.split(key, 8)
    scale = 1.0 / jnp.sqrt(C)

    def w(k):
        return jax.random.normal(k, (C, C), jnp.float32) * scale

    def b(k):
        return jax.random.normal(k, (C,), jnp.float32) * scale

    return dict(
        w_sc0=w(ks[0]), b_sc0=b(ks[1]),
        w_sc1=w(ks[2]), b_sc1=b(ks[3]),
        w_sh0=w(ks[4]), b_sh0=b(ks[5]),
        w_sh1=w(ks[6]), b_sh1=b(ks[7]),
    )


def modulation_ref(x, y, p):
    """Pure-JAX f32 reference with the original module semantics."""
    N, Cc, H, W = x.shape
    xr = x.reshape(N, Cc, H * W)
    yr = y.reshape(N, Cc, H * W)

    def conv(v, w, b):
        return jnp.einsum("oc,ncs->nos", w, v) + b[None, :, None]

    lrelu = lambda v: jnp.where(v >= 0, v, 0.1 * v)
    s = conv(lrelu(conv(yr, p["w_sc0"], p["b_sc0"])), p["w_sc1"], p["b_sc1"])
    t = conv(lrelu(conv(yr, p["w_sh0"], p["b_sh0"])), p["w_sh1"], p["b_sh1"])
    return (xr * (s + 1.0) + t).reshape(N, Cc, H, W)


if __name__ == "__main__":
    key = jax.random.PRNGKey(0)
    k_x, k_y, k_p = jax.random.split(key, 3)

    # Small shapes consistent with the module: channels fixed at 64.
    N, H, W = 2, 16, 16
    x = jax.random.normal(k_x, (N, C, H, W), jnp.float32)
    y = jax.random.normal(k_y, (N, C, H, W), jnp.float32)
    params = init_params(k_p)

    # Pack (and bf16-cast) weights once, outside the per-call path.
    w0, w1, b = pack_params(params)

    out = jax.block_until_ready(modulation_pallas(x, y, w0, w1, b))

    ref = modulation_ref(x, y, params)
    assert out.shape == (N, C, H, W)
    # bf16 matmul operands -> loosened tolerance vs the f32 reference.
    abs_err = float(jnp.max(jnp.abs(out - ref)))
    rel_err = float(jnp.linalg.norm(out - ref) / jnp.linalg.norm(ref))
    assert rel_err < 2e-2 and abs_err < 2.5e-1, (abs_err, rel_err)

    print("KERNEL_OK")
</pallas_src>

<mosaic_0001>
module attributes {stable_mosaic.version = 11 : i64} {
  func.func @_modulation_kernel(%arg0: i32, %arg1: i32, %arg2: memref<1x64x128xf32, #tpu.memory_space<vmem>>, %arg3: memref<1x64x128xf32, #tpu.memory_space<vmem>>, %arg4: memref<128x64xbf16, #tpu.memory_space<vmem>>, %arg5: memref<128x128xbf16, #tpu.memory_space<vmem>>, %arg6: memref<2x128x1xf32, #tpu.memory_space<vmem>>, %arg7: memref<1x64x128xf32, #tpu.memory_space<vmem>>) attributes {dimension_semantics = [#tpu.dimension_semantics<parallel>, #tpu.dimension_semantics<parallel>], iteration_bounds = array<i64: 2, 2>, scalar_prefetch = 0 : i64, scratch_operands = 0 : i64, tpu.core_type = #tpu.core_type<tc>, window_params = [{transform_indices = @transform_0, window_bounds = array<i64: 1, 64, 128>}, {transform_indices = @transform_1, window_bounds = array<i64: 1, 64, 128>}, {pipeline_mode = #tpu.pipeline_mode<synchronous>, transform_indices = @transform_2, window_bounds = array<i64: 128, 64>}, {pipeline_mode = #tpu.pipeline_mode<synchronous>, transform_indices = @transform_3, window_bounds = array<i64: 128, 128>}, {pipeline_mode = #tpu.pipeline_mode<synchronous>, transform_indices = @transform_4, window_bounds = array<i64: 2, 128, 1>}, {transform_indices = @transform_5, window_bounds = array<i64: 1, 64, 128>}]} {
    %c0 = arith.constant 0 : index
    %c0_0 = arith.constant 0 : index
    %c0_1 = arith.constant 0 : index
    %0 = vector.load %arg2[%c0, %c0_0, %c0_1] : memref<1x64x128xf32, #tpu.memory_space<vmem>>, vector<1x64x128xf32>
    %1 = vector.shape_cast %0 : vector<1x64x128xf32> to vector<64x128xf32>
    %c0_2 = arith.constant 0 : index
    %c0_3 = arith.constant 0 : index
    %c0_4 = arith.constant 0 : index
    %2 = vector.load %arg3[%c0_2, %c0_3, %c0_4] : memref<1x64x128xf32, #tpu.memory_space<vmem>>, vector<1x64x128xf32>
    %3 = vector.shape_cast %2 : vector<1x64x128xf32> to vector<64x128xf32>
    %c0_5 = arith.constant 0 : index
    %c0_6 = arith.constant 0 : index
    %4 = vector.load %arg4[%c0_5, %c0_6] : memref<128x64xbf16, #tpu.memory_space<vmem>>, vector<128x64xbf16>
    %5 = arith.truncf %3 : vector<64x128xf32> to vector<64x128xbf16>
    %cst = arith.constant dense<0.000000e+00> : vector<128x128xf32>
    %6 = tpu.matmul %4, %5, %cst {dimension_numbers = #tpu.dot_dimension_numbers<[1], [0], [0], [1], [0, 0, 1, 1], [], []>} : vector<128x64xbf16>, vector<64x128xbf16>, vector<128x128xf32> -> vector<128x128xf32>
    %c0_7 = arith.constant 0 : index
    %c0_8 = arith.constant 0 : index
    %c0_9 = arith.constant 0 : index
    %7 = vector.load %arg6[%c0_7, %c0_8, %c0_9] : memref<2x128x1xf32, #tpu.memory_space<vmem>>, vector<1x128x1xf32>
    %8 = vector.shape_cast %7 : vector<1x128x1xf32> to vector<128x1xf32>
    %9 = vector.broadcast %8 : vector<128x1xf32> to vector<128x128xf32>
    %10 = arith.addf %6, %9 : vector<128x128xf32>
    %cst_10 = arith.constant 1.000000e-01 : f32
    %11 = vector.broadcast %cst_10 : f32 to vector<128x128xf32>
    %12 = arith.mulf %11, %10 : vector<128x128xf32>
    %13 = arith.maximumf %10, %12 : vector<128x128xf32>
    %c0_11 = arith.constant 0 : index
    %c0_12 = arith.constant 0 : index
    %14 = vector.load %arg5[%c0_11, %c0_12] : memref<128x128xbf16, #tpu.memory_space<vmem>>, vector<128x128xbf16>
    %15 = arith.truncf %13 : vector<128x128xf32> to vector<128x128xbf16>
    %cst_13 = arith.constant dense<0.000000e+00> : vector<128x128xf32>
    %16 = tpu.matmul %14, %15, %cst_13 {dimension_numbers = #tpu.dot_dimension_numbers<[1], [0], [0], [1], [0, 0, 1, 1], [], []>} : vector<128x128xbf16>, vector<128x128xbf16>, vector<128x128xf32> -> vector<128x128xf32>
    %c1 = arith.constant 1 : index
    %c0_14 = arith.constant 0 : index
    %c0_15 = arith.constant 0 : index
    %17 = vector.load %arg6[%c1, %c0_14, %c0_15] : memref<2x128x1xf32, #tpu.memory_space<vmem>>, vector<1x128x1xf32>
    %18 = vector.shape_cast %17 : vector<1x128x1xf32> to vector<128x1xf32>
    %19 = vector.broadcast %18 : vector<128x1xf32> to vector<128x128xf32>
    %20 = arith.addf %16, %19 : vector<128x128xf32>
    %21 = vector.extract_strided_slice %20 {offsets = [0, 0], sizes = [64, 128], strides = [1, 1]} : vector<128x128xf32> to vector<64x128xf32>
    %22 = vector.extract_strided_slice %20 {offsets = [64, 0], sizes = [64, 128], strides = [1, 1]} : vector<128x128xf32> to vector<64x128xf32>
    %23 = arith.mulf %1, %21 : vector<64x128xf32>
    %24 = arith.addf %23, %22 : vector<64x128xf32>
    %c0_16 = arith.constant 0 : index
    %c0_17 = arith.constant 0 : index
    %c0_18 = arith.constant 0 : index
    %25 = vector.load %arg7[%c0_16, %c0_17, %c0_18] : memref<1x64x128xf32, #tpu.memory_space<vmem>>, vector<1x64x128xf32>
    %26 = vector.shape_cast %25 : vector<1x64x128xf32> to vector<64x128xf32>
    %27 = vector.shape_cast %24 : vector<64x128xf32> to vector<1x64x128xf32>
    tpu.vector_store %arg7[%c0_16, %c0_17, %c0_18], %27 {strides = array<i32>} : memref<1x64x128xf32, #tpu.memory_space<vmem>>, vector<1x64x128xf32>,
    return
  }
  func.func @transform_0(%arg0: i32, %arg1: i32) -> (i32, i32, i32) {
    %c0_i32 = arith.constant 0 : i32
    %c0_i32_0 = arith.constant 0 : i32
    return %arg0, %c0_i32, %arg1 : i32, i32, i32
  }
  func.func @transform_1(%arg0: i32, %arg1: i32) -> (i32, i32, i32) {
    %c0_i32 = arith.constant 0 : i32
    %c0_i32_0 = arith.constant 0 : i32
    return %arg0, %c0_i32, %arg1 : i32, i32, i32
  }
  func.func @transform_2(%arg0: i32, %arg1: i32) -> (i32, i32) {
    %c0_i32 = arith.constant 0 : i32
    %c0_i32_0 = arith.constant 0 : i32
    %c0_i32_1 = arith.constant 0 : i32
    return %c0_i32, %c0_i32_0 : i32, i32
  }
  func.func @transform_3(%arg0: i32, %arg1: i32) -> (i32, i32) {
    %c0_i32 = arith.constant 0 : i32
    %c0_i32_0 = arith.constant 0 : i32
    %c0_i32_1 = arith.constant 0 : i32
    return %c0_i32, %c0_i32_0 : i32, i32
  }
  func.func @transform_4(%arg0: i32, %arg1: i32) -> (i32, i32, i32) {
    %c0_i32 = arith.constant 0 : i32
    %c0_i32_0 = arith.constant 0 : i32
    %c0_i32_1 = arith.constant 0 : i32
    %c0_i32_2 = arith.constant 0 : i32
    return %c0_i32, %c0_i32_0, %c0_i32_1 : i32, i32, i32
  }
  func.func @transform_5(%arg0: i32, %arg1: i32) -> (i32, i32, i32) {
    %c0_i32 = arith.constant 0 : i32
    %c0_i32_0 = arith.constant 0 : i32
    return %arg0, %c0_i32, %arg1 : i32, i32, i32
  }
}

</mosaic_0001>

<bundles_post_ra>
// kernel: modulation_pallas.1
= control target key start
LH: loop header
LB: loop body
LE: loop exit
PB: predicated region body
PF: predicated region fallthrough
CT: control target
= control target key end

     0   :  { %s1486_s18 = smov 0   ;;  %s1488_s19 = smov 0   ;;  %s1781_s0 = inlined_call_operand.vmem [shape: f32[2,64,256], index: 0, kind: input, shape index: {}]   ;;  %s1782_s1 = inlined_call_operand.vmem [shape: f32[2,64,256], index: 1, kind: input, shape index: {}]   ;;  %s1783_s2 = inlined_call_operand.vmem [shape: bf16[128,64], index: 2, kind: input, shape index: {}]   ;;  %s1784_s3 = inlined_call_operand.vmem [shape: bf16[128,128], index: 3, kind: input, shape index: {}]   ;;  %s1785_s4 = inlined_call_operand.vmem [shape: f32[2,128,1], index: 4, kind: input, shape index: {}]   ;;  %s1786_s5 = inlined_call_operand.vmem [shape: f32[2,64,256], index: 5, kind: output, shape index: {}]  }
   0x1   :  { %s1490_s20 = smov 0   ;;  %s1492_s21 = smov 0  }
   0x2   :  { %s1494_s22 = smov 0   ;;  %s1496_s23 = smov 0  }
   0x3   :  { %s1498_s24 = smov 0  }
   0x4 LB: > { %s24_s25 = sadd.s32 1, %s1445_s22  ;;  %s27_s26 = sadd.s32 1, %s1449_s23  ;;  %s1453_s24 = sphi %s1498_s24, %s15_s24   ;;  %s1449_s23 = sphi %s1496_s23, %s1794_s23   ;;  %s1445_s22 = sphi %s1494_s22, %s1793_s22   ;;  %s1441_s21 = sphi %s1492_s21, %s1792_s21   ;;  %s1437_s20 = sphi %s1490_s20, %s1791_s20   ;;  %s1433_s19 = sphi %s1488_s19, %s1790_s19   ;;  %s1429_s18 = sphi %s1486_s18, %s1789_s18  }
   0x5   : > { %p25_p0 = scmp.ge.s32.totalorder %s24_s25, 2  ;;  %s1165_s27 = sadd.s32 4294967295, %s1453_s24  }
   0x6   : > { %p43_p1 = scmp.ne.s32.totalorder %s1433_s19, %s1429_s18  ;;  %p44_p2 = scmp.eq.s32.totalorder %s1453_s24, 0 }
   0x7   : > { %s1796_s25 = smov (%p25_p0, %s24_s25), 0  ;;  %s1798_s26 = smov (!%p25_p0, %s27_s26), %s1449_s23 }
   0x8   : > { %p29_p3 = scmp.ge.s32.totalorder %s1798_s26, 2  ;;  %p166_p4 = scmp.eq.s32.totalorder %s1165_s27, 3 }
   0x9   : > { %s32_s28 = ssub.s32 %s1445_s22, %s1796_s25  ;;  %p1532_p5 = por %p44_p2, %p43_p1 }
   0xa   : > { %s1800_s26 = smov (%p29_p3, %s1798_s26), 0  ;;  %p1538_p6 = por %p166_p4, %p43_p1 }
   0xb   : > { %s31_s6 = ssub.s32 %s1449_s23, %s1800_s26  ;;  %s36_s8 = sadd.s32 1, %s1433_s19 }
   0xc   : > { %s33_s7 = sor.u32 %s32_s28, %s31_s6  ;;  %p1168_p8 = scmp.ge.s32.totalorder %s1453_s24, 4 }
   0xd   : > { %p34_p7 = scmp.eq.s32.totalorder %s33_s7, 0 }
   0xe   : > { %197 = sbr.rel (%p1168_p8) target bundleno = 41 (0x29), region = 28 }
   0xf   : > { %s1546_s9 = scalar_select %p34_p7, %s1433_s19, %s36_s8  }
  0x15   : > { %200 = sbr.rel (!%p1532_p5) target bundleno = 31 (0x1f), region = 32  ;;  %s202_s10 = sand.u32 (%p1532_p5), 1, %s1433_s19  }
  0x16   : > { %s1170_s11 = sshll.u32 (%p1532_p5), %s1449_s23, 4  ;;  %s1169_s12 = sshll.u32 (%p1532_p5), %s202_s10, 6 }
  0x17   : > { %s206_s13 = sadd.s32 (%p1532_p5), %s1445_s22, %s1170_s11  ;;  %s204_s27 = scalar_lea.vmem (%p1532_p5), [#allocation2], %s1169_s12 }
  0x18   : > { %s1171_s14 = sshll.u32 (%p1532_p5), %s206_s13, 3 }
  0x19   : > { %s208_s17 = scalar_lea.vmem (%p1532_p5), %s1781_s0, %s1171_s14 }
  0x1a   : > { %v250_v0 = vld [vmem:[%s208_s17] sm:$0xff] (%p1532_p5)  ;;  %v252_v1 = vld [vmem:[%s208_s17 + $0x10] sm:$0xff] (%p1532_p5) }
  0x1b   : > { %v254_v2 = vld [vmem:[%s208_s17 + $0x20] sm:$0xff] (%p1532_p5)  ;;  %251 = vst [vmem:[%s204_s27] sm:$0xff] (%p1532_p5), %v250_v0  ;;  %253 = vst [vmem:[%s204_s27 + $0x8] sm:$0xff] (%p1532_p5), %v252_v1  ;;  %v256_v3 = vld [vmem:[%s208_s17 + $0x30] sm:$0xff] (%p1532_p5) }
  0x1c   : > { %255 = vst [vmem:[%s204_s27 + $0x10] sm:$0xff] %v254_v2  ;;  %v258_v4 = vld [vmem:[%s208_s17 + $0x40] sm:$0xff]  ;;  %v260_v5 = vld [vmem:[%s208_s17 + $0x50] sm:$0xff]  ;;  %257 = vst [vmem:[%s204_s27 + $0x18] sm:$0xff] %v256_v3 }
  0x1d   : > { %259 = vst [vmem:[%s204_s27 + $0x20] sm:$0xff] %v258_v4  ;;  %261 = vst [vmem:[%s204_s27 + $0x28] sm:$0xff] %v260_v5  ;;  %v262_v6 = vld [vmem:[%s208_s17 + $0x60] sm:$0xff]  ;;  %v264_v7 = vld [vmem:[%s208_s17 + $0x70] sm:$0xff] }
  0x1e   : > { %263 = vst [vmem:[%s204_s27 + $0x30] sm:$0xff] %v262_v6  ;;  %265 = vst [vmem:[%s204_s27 + $0x38] sm:$0xff] %v264_v7 }
  0x1f PF: > { %271 = sbr.rel (!%p1532_p5) target bundleno = 41 (0x29), region = 70  ;;  %s273_s28 = sand.u32 (%p1532_p5), 1, %s1433_s19  }
  0x20   : > { %s1173_s6 = sshll.u32 (%p1532_p5), %s1449_s23, 4  ;;  %s1172_s7 = sshll.u32 (%p1532_p5), %s273_s28, 6 }
  0x21   : > { %s277_s8 = sadd.s32 (%p1532_p5), %s1445_s22, %s1173_s6  ;;  %s275_s14 = scalar_lea.vmem (%p1532_p5), [#allocation3], %s1172_s7 }
  0x22   : > { %s1174_s10 = sshll.u32 (%p1532_p5), %s277_s8, 3 }
  0x23   : > { %s279_s13 = scalar_lea.vmem (%p1532_p5), %s1782_s1, %s1174_s10 }
  0x24   : > { %v321_v8 = vld [vmem:[%s279_s13] sm:$0xff] (%p1532_p5)  ;;  %v323_v9 = vld [vmem:[%s279_s13 + $0x10] sm:$0xff] (%p1532_p5) }
  0x25   : > { %v325_v10 = vld [vmem:[%s279_s13 + $0x20] sm:$0xff] (%p1532_p5)  ;;  %322 = vst [vmem:[%s275_s14] sm:$0xff] (%p1532_p5), %v321_v8  ;;  %324 = vst [vmem:[%s275_s14 + $0x8] sm:$0xff] (%p1532_p5), %v323_v9  ;;  %v327_v11 = vld [vmem:[%s279_s13 + $0x30] sm:$0xff] (%p1532_p5) }
  0x26   : > { %326 = vst [vmem:[%s275_s14 + $0x10] sm:$0xff] %v325_v10  ;;  %v329_v12 = vld [vmem:[%s279_s13 + $0x40] sm:$0xff]  ;;  %v331_v13 = vld [vmem:[%s279_s13 + $0x50] sm:$0xff]  ;;  %328 = vst [vmem:[%s275_s14 + $0x18] sm:$0xff] %v327_v11 }
  0x27   : > { %330 = vst [vmem:[%s275_s14 + $0x20] sm:$0xff] %v329_v12  ;;  %332 = vst [vmem:[%s275_s14 + $0x28] sm:$0xff] %v331_v13  ;;  %v333_v14 = vld [vmem:[%s279_s13 + $0x60] sm:$0xff]  ;;  %v335_v15 = vld [vmem:[%s279_s13 + $0x70] sm:$0xff] }
  0x28   : > { %334 = vst [vmem:[%s275_s14 + $0x30] sm:$0xff] %v333_v14  ;;  %336 = vst [vmem:[%s275_s14 + $0x38] sm:$0xff] %v335_v15 }
  0x29 PF: > { %p1175_p9 = scmp.ge.s32.totalorder %s1453_s24, 1  ;;  %p341_p10 = scmp.lt.s32.totalorder %s1453_s24, 5 }
  0x2b   : > { %p342_p11 = pnand %p1175_p9, %p341_p10 }
  0x2c   : > { %s348_s29 = sand.u32 (!%p342_p11), 1, %s1429_s18   ;;  %v1383_v16 = vld [vmem:[%s1783_s2] sm:$0xff] (!%p342_p11)   ;;  %vm558_vm0 = vcmask (!%p342_p11), 523264   ;;  %v1455_v22 = vmov (!%p342_p11), 0   ;;  %v424_v30 = vld [vmem:[%s1785_s4 + $0x10] sm:$0xff] (!%p342_p11)  ;;  %v423_v31 = vld [vmem:[%s1785_s4 + $0x8] sm:$0xff] (!%p342_p11) }
  0x2d   : > { %345 = sbr.rel (%p342_p11) target bundleno = 565 (0x235), region = 108  ;;  %s1571_s17 = sshll.u32 (!%p342_p11), %s348_s29, 6  ;;  %1260 = vmatprep.mubr.msk.bf16.mxu0 (!%p342_p11), %vm558_vm0, %v1383_v16  ;;  %1381 = vset.pattern.permute.xlu0 (!%p342_p11), %v1455_v22  ;;  %v422_v29 = vld [vmem:[%s1785_s4] sm:$0xff] (!%p342_p11)  ;;  %v425_v33 = vld [vmem:[%s1785_s4 + $0x18] sm:$0xff] (!%p342_p11)  ;;  %v427_v35 = vld [vmem:[%s1785_s4 + $0x28] sm:$0xff] (!%p342_p11) }
  0x2e   : > { %s357_s27 = scalar_lea.vmem (!%p342_p11), [#allocation3], %s1571_s17  ;;  %1382 = vset.pattern.permute.xlu1 (!%p342_p11), %v1455_v22  ;;  %440 = vperm.xlu0 (!%p342_p11), %1381, %v422_v29   ;;  %v426_v34 = vld [vmem:[%s1785_s4 + $0x20] sm:$0xff] (!%p342_p11)  ;;  %v1384_v36 = vld [vmem:[%s1783_s2 + $0x8] sm:$0xff] (!%p342_p11)   ;;  %v1385_v37 = vld [vmem:[%s1783_s2 + $0x10] sm:$0xff] (!%p342_p11)   ;;  %s1724_s29 = scalar_lea.vmem (!%p342_p11), [#allocation2], %s1571_s17 }
  0x2f   : > { %v394_v17 = vld [vmem:[%s357_s27] sm:$0xff] (!%p342_p11)  ;;  %v395_v18 = vld [vmem:[%s357_s27 + $0x8] sm:$0xff] (!%p342_p11)  ;;  %v396_v19 = vld [vmem:[%s357_s27 + $0x10] sm:$0xff] (!%p342_p11)  ;;  %450 = vperm.xlu1 (!%p342_p11), %1382, %v424_v30   ;;  %s1731_s15 = scalar_lea.vmem (!%p342_p11), [#allocation4], %s1571_s17 }
  0x30   : > { %v418_v20 = vpack.c.bf16 (!%p342_p11), %v395_v18, %v394_v17  ;;  %v397_v21 = vld [vmem:[%s357_s27 + $0x18] sm:$0xff] (!%p342_p11)  ;;  %v398_v24 = vld [vmem:[%s357_s27 + $0x20] sm:$0xff] (!%p342_p11)  ;;  %v399_v25 = vld [vmem:[%s357_s27 + $0x28] sm:$0xff] (!%p342_p11) }
  0x31   : > { %v419_v23 = vpack.c.bf16 (!%p342_p11), %v397_v21, %v396_v19  ;;  %v400_v26 = vld [vmem:[%s357_s27 + $0x30] sm:$0xff] (!%p342_p11)  ;;  %v420_v27 = vpack.c.bf16 (!%p342_p11), %v399_v25, %v398_v24  ;;  %v401_v28 = vld [vmem:[%s357_s27 + $0x38] sm:$0xff] (!%p342_p11)  ;;  %v430_v40 = vld [vmem:[%s1785_s4 + $0x40] sm:$0xff] (!%p342_p11) }
  0x32   : > { %1252 = vmatprep.subr.bf16.mxu0 (!%p342_p11), %v418_v20  ;;  %v421_v32 = vpack.c.bf16 (!%p342_p11), %v401_v28, %v400_v26  ;;  %445 = vperm.xlu0 (!%p342_p11), %1381, %v423_v31   ;;  %v428_v38 = vld [vmem:[%s1785_s4 + $0x30] sm:$0xff] (!%p342_p11)  ;;  %v429_v39 = vld [vmem:[%s1785_s4 + $0x38] sm:$0xff] (!%p342_p11)  ;;  %v431_v41 = vld [vmem:[%s1785_s4 + $0x48] sm:$0xff] (!%p342_p11) }
  0x33   : > { %1253 = vmatpush3.bf16.msra.mxu0 (!%p342_p11), %v418_v20  ;;  %455 = vperm.xlu1 (!%p342_p11), %1382, %v425_v33   ;;  %v1386_v42 = vld [vmem:[%s1783_s2 + $0x18] sm:$0xff] (!%p342_p11)   ;;  %v1387_v43 = vld [vmem:[%s1783_s2 + $0x20] sm:$0xff] (!%p342_p11)   ;;  %v432_v44 = vld [vmem:[%s1785_s4 + $0x50] sm:$0xff] (!%p342_p11) }
  0x34   : > { %1254 = vmatprep.subr.bf16.mxu0 %v419_v23  ;;  %v433_v45 = vld [vmem:[%s1785_s4 + $0x58] sm:$0xff]  ;;  %v434_v46 = vld [vmem:[%s1785_s4 + $0x60] sm:$0xff]  ;;  %v435_v47 = vld [vmem:[%s1785_s4 + $0x68] sm:$0xff]  ;;  %s1220_s17 = sshll.u32 (%p1538_p6), %s1441_s21, 4 }
  0x35   : > { %v1388_v48 = vld [vmem:[%s1783_s2 + $0x28] sm:$0xff]   ;;  %v1389_v49 = vld [vmem:[%s1783_s2 + $0x30] sm:$0xff]   ;;  %v437_v51 = vld [vmem:[%s1785_s4 + $0x78] sm:$0xff]  ;;  %s1010_s16 = sadd.s32 (%p1538_p6), %s1437_s20, %s1220_s17 }
  0x36   : > { %460 = vperm.xlu0 %1381, %v426_v34   ;;  %v436_v50 = vld [vmem:[%s1785_s4 + $0x70] sm:$0xff]  ;;  %v1195_v52 = vld [vmem:[%s1785_s4 + $0x80] sm:$0xff]  ;;  %v1196_v53 = vld [vmem:[%s1785_s4 + $0x88] sm:$0xff]  ;;  %s1221_s30 = sshll.u32 (%p1538_p6), %s1010_s16, 3 }
  0x37   : > { %1255 = vmatpush3.bf16.msra.mxu0 %v419_v23  ;;  %465 = vperm.xlu1 %1382, %v427_v35   ;;  %v1390_v54 = vld [vmem:[%s1783_s2 + $0x38] sm:$0xff]   ;;  %v1197_v55 = vld [vmem:[%s1785_s4 + $0x90] sm:$0xff]  ;;  %v1199_v57 = vld [vmem:[%s1785_s4 + $0xa0] sm:$0xff]  ;;  %s1012_s28 = scalar_lea.vmem (%p1538_p6), %s1786_s5, %s1221_s30 }
  0x38   : > { %1256 = vmatprep.subr.bf16.mxu0 %v420_v27  ;;  %v1198_v56 = vld [vmem:[%s1785_s4 + $0x98] sm:$0xff]  ;;  %v1200_v58 = vld [vmem:[%s1785_s4 + $0xa8] sm:$0xff]  ;;  %v1201_v59 = vld [vmem:[%s1785_s4 + $0xb0] sm:$0xff] }
  0x39   : > { %v1202_v60 = vld [vmem:[%s1785_s4 + $0xb8] sm:$0xff]  ;;  %v1203_v61 = vld [vmem:[%s1785_s4 + $0xc0] sm:$0xff]  ;;  %v1204_v62 = vld [vmem:[%s1785_s4 + $0xc8] sm:$0xff] }
  0x3a   : > { %470 = vperm.xlu0 %1381, %v428_v38   ;;  %v1205_v63 = vld [vmem:[%s1785_s4 + $0xd0] sm:$0xff]  ;;  %v1206_v0 = vld [vmem:[%s1785_s4 + $0xd8] sm:$0xff]  ;;  %v1207_v1 = vld [vmem:[%s1785_s4 + $0xe0] sm:$0xff] }
  0x3b   : > { %1257 = vmatpush3.bf16.msra.mxu0 %v420_v27  ;;  %475 = vperm.xlu1 %1382, %v429_v39   ;;  %v1208_v2 = vld [vmem:[%s1785_s4 + $0xe8] sm:$0xff]  ;;  %v1209_v3 = vld [vmem:[%s1785_s4 + $0xf0] sm:$0xff]  ;;  %v1210_v4 = vld [vmem:[%s1785_s4 + $0xf8] sm:$0xff] }
  0x3c   : > { %1258 = vmatprep.subr.bf16.mxu0 %v421_v32  ;;  %v1391_v5 = vld [vmem:[%s1784_s3] sm:$0xff]   ;;  %v1392_v6 = vld [vmem:[%s1784_s3 + $0x10] sm:$0xff]  }
  0x3d   : > { %1296 = vmatprep.mubr.bf16.mxu1 %v1392_v6 }
  0x3e   : > { %480 = vperm.xlu0 %1381, %v430_v40  }
  0x3f   : > { %1259 = vmatpush3.bf16.msra.mxu0 %v421_v32  ;;  %485 = vperm.xlu1 %1382, %v431_v41  }
  0x42   : > { %1261 = vmatmul.mubr.msk.bf16.vlgmr.msra.gmra.mrb[0].mxu0 %vm558_vm0, %v1384_v36  ;;  %490 = vperm.xlu0 %1381, %v432_v44  }
  0x43   : > { %1264 = vmatprep.mubr.msk.bf16.mxu0 %vm558_vm0, %v1385_v37  ;;  %495 = vperm.xlu1 %1382, %v433_v45  }
  0x46   : > { %500 = vperm.xlu0 %1381, %v434_v46  }
  0x47   : > { %505 = vperm.xlu1 %1382, %v435_v47  }
  0x4a   : > { %1265 = vmatmul.mubr.msk.bf16.gmra.mrb[4].mxu0 %vm558_vm0, %v1386_v42  ;;  %510 = vperm.xlu0 %1381, %v436_v50  }
  0x4b   : > { %1268 = vmatprep.mubr.msk.bf16.mxu0 %vm558_vm0, %v1387_v43  ;;  %515 = vperm.xlu1 %1382, %v437_v51  }
  0x4e   : > { %755 = vperm.xlu0 %1381, %v1195_v52  }
  0x4f   : > { %760 = vperm.xlu1 %1382, %v1196_v53  }
  0x52   : > { %1269 = vmatmul.mubr.msk.bf16.gmra.mrb[8].mxu0 %vm558_vm0, %v1388_v48  ;;  %765 = vperm.xlu0 %1381, %v1197_v55  }
  0x53   : > { %1272 = vmatprep.mubr.msk.bf16.mxu0 %vm558_vm0, %v1389_v49  ;;  %770 = vperm.xlu1 %1382, %v1198_v56  }
  0x56   : > { %775 = vperm.xlu0 %1381, %v1199_v57  }
  0x57   : > { %780 = vperm.xlu1 %1382, %v1200_v58  }
  0x5a   : > { %1273 = vmatmul.mubr.msk.bf16.gmra.mrb[12].mxu0 %vm558_vm0, %v1390_v54  ;;  %785 = vperm.xlu0 %1381, %v1201_v59  }
  0x5b   : > { %790 = vperm.xlu1 %1382, %v1202_v60   ;;  %1292 = vmatprep.mubr.bf16.mxu0 %v1391_v5 }
  0x5e   : > { %795 = vperm.xlu0 %1381, %v1203_v61  }
  0x5f   : > { %800 = vperm.xlu1 %1382, %v1204_v62  }
  0x62   : > { %805 = vperm.xlu0 %1381, %v1205_v63  }
  0x63   : > { %810 = vperm.xlu1 %1382, %v1206_v0  }
  0x66   : > { %815 = vperm.xlu0 %1381, %v1207_v1  }
  0x67   : > { %820 = vperm.xlu1 %1382, %v1208_v2  }
  0x6a   : > { %825 = vperm.xlu0 %1381, %v1209_v3  }
  0x6b   : > { %830 = vperm.xlu1 %1382, %v1210_v4  }
  0xad   : > { %v441_v7 = vpop.permute.xlu0 %440 }
  0xae   : > { %v451_v8 = vpop.permute.xlu1 %450 }
  0xb1   : > { %v446_v9 = vpop.permute.xlu0 %445 }
  0xb2   : > { %v456_v10 = vpop.permute.xlu1 %455 }
  0xb5   : > { %v461_v11 = vpop.permute.xlu0 %460 }
  0xb6   : > { %v466_v12 = vpop.permute.xlu1 %465 }
  0xb9   : > { %v471_v13 = vpop.permute.xlu0 %470 }
  0xba   : > { %v476_v17 = vpop.permute.xlu1 %475 }
  0xbd   : > { %v481_v26 = vpop.permute.xlu0 %480 }
  0xbe   : > { %v486_v30 = vpop.permute.xlu1 %485 }
  0xc1   : > { %v491_v43 = vpop.permute.xlu0 %490 }
  0xc2   : > { %v496_v47 = vpop.permute.xlu1 %495 }
  0xc5   : > { %v501_v57 = vpop.permute.xlu0 %500 }
  0xc6   : > { %v506_v0 = vpop.permute.xlu1 %505 }
 0x115   : > { %v1262_v14 = vpop.f32.mrb[0].mxu0 }
 0x116   : > { %v626_v15 = vadd.f32 %v1262_v14, %v451_v8  ;;  %v617_v16 = vpop.f32.mrb[1].mxu0  ;;  %v516_v14 = vpop.permute.xlu1 %515 }
 0x117   : > { %v618_v18 = vadd.f32 %v617_v16, %v441_v7  ;;  %v1263_v19 = vpop.f32.mrb[2].mxu0  ;;  %v511_v7 = vpop.permute.xlu0 %510 }
 0x118   : > { %v682_v20 = vmul.f32 0.1, %v626_v15  ;;  %v629_v21 = vadd.f32 %v1263_v19, %v456_v10  ;;  %v620_v22 = vpop.f32.mrb[3].mxu0 }
 0x119   : > { %v680_v23 = vmul.f32 0.1, %v618_v18  ;;  %v621_v24 = vadd.f32 %v620_v22, %v446_v9 }
 0x11a   : > { %v683_v25 = vmul.f32 0.1, %v629_v21  ;;  %v698_v28 = vmax.f32 %v626_v15, %v682_v20 }
 0x11b   : > { %v681_v27 = vmul.f32 0.1, %v621_v24  ;;  %v696_v31 = vmax.f32 %v618_v18, %v680_v23 }
 0x11c   : > { %v699_v29 = vmax.f32 %v629_v21, %v683_v25 }
 0x11d   : > { %v697_v32 = vmax.f32 %v621_v24, %v681_v27  ;;  %v1266_v33 = vpop.f32.mrb[4].mxu0 }
 0x11e   : > { %v729_v34 = vpack.c.bf16 %v699_v29, %v698_v28  ;;  %v642_v35 = vadd.f32 %v1266_v33, %v471_v13  ;;  %v633_v36 = vpop.f32.mrb[5].mxu0  ;;  %v1395_v33 = vld [vmem:[%s1784_s3 + $0x20] sm:$0xff]  }
 0x11f   : > { %v728_v37 = vpack.c.bf16 %v697_v32, %v696_v31  ;;  %v634_v38 = vadd.f32 %v633_v36, %v461_v11  ;;  %v1267_v39 = vpop.f32.mrb[6].mxu0  ;;  %v1393_v31 = vld [vmem:[%s1784_s3 + $0x8] sm:$0xff]   ;;  %v1394_v32 = vld [vmem:[%s1784_s3 + $0x18] sm:$0xff]  }
 0x120   : > { %v686_v40 = vmul.f32 0.1, %v642_v35  ;;  %v645_v41 = vadd.f32 %v1267_v39, %v476_v17  ;;  %v636_v42 = vpop.f32.mrb[7].mxu0  ;;  %v1398_v36 = vld [vmem:[%s1784_s3 + $0x38] sm:$0xff]  }
 0x121   : > { %v684_v44 = vmul.f32 0.1, %v634_v38  ;;  %v637_v45 = vadd.f32 %v636_v42, %v466_v12  ;;  %1276 = vmatprep.subr.bf16.mxu0 %v728_v37  ;;  %1308 = vmatprep.subr.bf16.mxu1 %v728_v37 }
 0x122   : > { %v687_v46 = vmul.f32 0.1, %v645_v41  ;;  %1277 = vmatpush3.bf16.msra.mxu0 %v728_v37  ;;  %1316 = vmatpush3.bf16.msra.mxu1 %v728_v37  ;;  %v702_v49 = vmax.f32 %v642_v35, %v686_v40  ;;  %v1397_v35 = vld [vmem:[%s1784_s3 + $0x30] sm:$0xff]   ;;  %v756_v37 = vpop.permute.xlu0 %755 }
 0x123   : > { %v685_v48 = vmul.f32 0.1, %v637_v45  ;;  %1278 = vmatprep.subr.bf16.mxu0 %v729_v34  ;;  %1309 = vmatprep.subr.bf16.mxu1 %v729_v34  ;;  %v700_v51 = vmax.f32 %v634_v38, %v684_v44  ;;  %v761_v38 = vpop.permute.xlu1 %760 }
 0x124   : > { %v703_v50 = vmax.f32 %v645_v41, %v687_v46 }
 0x125   : > { %v701_v52 = vmax.f32 %v637_v45, %v685_v48  ;;  %v1270_v53 = vpop.f32.mrb[8].mxu0 }
 0x126   : > { %v731_v54 = vpack.c.bf16 %v703_v50, %v702_v49  ;;  %v658_v55 = vadd.f32 %v1270_v53, %v491_v43  ;;  %v649_v56 = vpop.f32.mrb[9].mxu0  ;;  %1279 = vmatpush3.bf16.msra.mxu0 %v729_v34  ;;  %1317 = vmatpush3.bf16.msra.mxu1 %v729_v34  ;;  %v1396_v34 = vld [vmem:[%s1784_s3 + $0x28] sm:$0xff]   ;;  %v766_v39 = vpop.permute.xlu0 %765 }
 0x127   : > { %v730_v58 = vpack.c.bf16 %v701_v52, %v700_v51  ;;  %v650_v59 = vadd.f32 %v649_v56, %v481_v26  ;;  %v1271_v60 = vpop.f32.mrb[10].mxu0  ;;  %v771_v40 = vpop.permute.xlu1 %770 }
 0x128   : > { %v690_v61 = vmul.f32 0.1, %v658_v55  ;;  %v661_v62 = vadd.f32 %v1271_v60, %v496_v47  ;;  %v652_v63 = vpop.f32.mrb[11].mxu0  ;;  %v386_v60 = vld [vmem:[%s1724_s29] sm:$0xff] }
 0x129   : > { %v688_v1 = vmul.f32 0.1, %v650_v59  ;;  %v653_v2 = vadd.f32 %v652_v63, %v486_v30  ;;  %1280 = vmatprep.subr.bf16.mxu0 %v730_v58  ;;  %1310 = vmatprep.subr.bf16.mxu1 %v730_v58 }
 0x12a   : > { %v691_v3 = vmul.f32 0.1, %v661_v62  ;;  %1281 = vmatpush3.bf16.msra.mxu0 %v730_v58  ;;  %1318 = vmatpush3.bf16.msra.mxu1 %v730_v58  ;;  %v706_v5 = vmax.f32 %v658_v55, %v690_v61  ;;  %v776_v41 = vpop.permute.xlu0 %775  ;;  %v388_v58 = vld [vmem:[%s1724_s29 + $0x10] sm:$0xff] }
 0x12b   : > { %v689_v4 = vmul.f32 0.1, %v653_v2  ;;  %1282 = vmatprep.subr.bf16.mxu0 %v731_v54  ;;  %1311 = vmatprep.subr.bf16.mxu1 %v731_v54  ;;  %v704_v8 = vmax.f32 %v650_v59, %v688_v1  ;;  %v781_v42 = vpop.permute.xlu1 %780 }
 0x12c   : > { %v707_v6 = vmax.f32 %v661_v62, %v691_v3  ;;  %v389_v62 = vld [vmem:[%s1724_s29 + $0x18] sm:$0xff] }
 0x12d   : > { %v705_v9 = vmax.f32 %v653_v2, %v689_v4  ;;  %v1274_v10 = vpop.f32.mrb[12].mxu0  ;;  %v387_v2 = vld [vmem:[%s1724_s29 + $0x8] sm:$0xff] }
 0x12e   : > { %v733_v11 = vpack.c.bf16 %v707_v6, %v706_v5  ;;  %v674_v12 = vadd.f32 %v1274_v10, %v511_v7  ;;  %v665_v13 = vpop.f32.mrb[13].mxu0  ;;  %1283 = vmatpush3.bf16.msra.mxu0 %v731_v54  ;;  %1319 = vmatpush3.bf16.msra.mxu1 %v731_v54  ;;  %v786_v43 = vpop.permute.xlu0 %785 }
 0x12f   : > { %v732_v15 = vpack.c.bf16 %v705_v9, %v704_v8  ;;  %v666_v16 = vadd.f32 %v665_v13, %v501_v57  ;;  %v1275_v17 = vpop.f32.mrb[14].mxu0  ;;  %v791_v44 = vpop.permute.xlu1 %790 }
 0x130   : > { %v694_v18 = vmul.f32 0.1, %v674_v12  ;;  %v677_v19 = vadd.f32 %v1275_v17, %v516_v14  ;;  %v668_v20 = vpop.f32.mrb[15].mxu0 }
 0x131   : > { %v692_v21 = vmul.f32 0.1, %v666_v16  ;;  %v669_v22 = vadd.f32 %v668_v20, %v506_v0  ;;  %1284 = vmatprep.subr.bf16.mxu0 %v732_v15  ;;  %1312 = vmatprep.subr.bf16.mxu1 %v732_v15 }
 0x132   : > { %v695_v23 = vmul.f32 0.1, %v677_v19  ;;  %1285 = vmatpush3.bf16.msra.mxu0 %v732_v15  ;;  %1320 = vmatpush3.bf16.msra.mxu1 %v732_v15  ;;  %v710_v25 = vmax.f32 %v674_v12, %v694_v18  ;;  %v796_v45 = vpop.permute.xlu0 %795 }
 0x133   : > { %v693_v24 = vmul.f32 0.1, %v669_v22  ;;  %1286 = vmatprep.subr.bf16.mxu0 %v733_v11  ;;  %1313 = vmatprep.subr.bf16.mxu1 %v733_v11  ;;  %v708_v27 = vmax.f32 %v666_v16, %v692_v21  ;;  %v801_v46 = vpop.permute.xlu1 %800 }
 0x134   : > { %v711_v26 = vmax.f32 %v677_v19, %v695_v23  ;;  %v392_v19 = vld [vmem:[%s1724_s29 + $0x30] sm:$0xff] }
 0x135   : > { %v709_v28 = vmax.f32 %v669_v22, %v693_v24  ;;  %v390_v22 = vld [vmem:[%s1724_s29 + $0x20] sm:$0xff] }
 0x136   : > { %v735_v29 = vpack.c.bf16 %v711_v26, %v710_v25  ;;  %1287 = vmatpush3.bf16.msra.mxu0 %v733_v11  ;;  %1321 = vmatpush3.bf16.msra.mxu1 %v733_v11  ;;  %v806_v55 = vpop.permute.xlu0 %805  ;;  %v393_v25 = vld [vmem:[%s1724_s29 + $0x38] sm:$0xff] }
 0x137   : > { %v734_v30 = vpack.c.bf16 %v709_v28, %v708_v27  ;;  %v811_v57 = vpop.permute.xlu1 %810 }
 0x139   : > { %1288 = vmatprep.subr.bf16.mxu0 %v734_v30  ;;  %1314 = vmatprep.subr.bf16.mxu1 %v734_v30 }
 0x13a   : > { %1289 = vmatpush3.bf16.msra.mxu0 %v734_v30  ;;  %1322 = vmatpush3.bf16.msra.mxu1 %v734_v30  ;;  %v816_v5 = vpop.permute.xlu0 %815 }
 0x13b   : > { %1290 = vmatprep.subr.bf16.mxu0 %v735_v29  ;;  %1315 = vmatprep.subr.bf16.mxu1 %v735_v29  ;;  %v821_v13 = vpop.permute.xlu1 %820 }
 0x13e   : > { %1291 = vmatpush3.bf16.msra.mxu0 %v735_v29  ;;  %1323 = vmatpush3.bf16.msra.mxu1 %v735_v29  ;;  %v826_v24 = vpop.permute.xlu0 %825  ;;  %v391_v29 = vld [vmem:[%s1724_s29 + $0x28] sm:$0xff] }
 0x141   : > { %1293 = vmatmul.mubr.bf16.vlgmr.msra.gmra.mrb[16].mxu0 %v1393_v31  ;;  %1297 = vmatmul.mubr.bf16.vlgmr.msra.gmra.mrb[0].mxu1 %v1394_v32  ;;  %v831_v32 = vpop.permute.xlu1 %830 }
 0x142   : > { %1300 = vmatprep.mubr.bf16.mxu1 %v1395_v33 }
 0x149   : > { %1301 = vmatmul.mubr.bf16.gmra.mrb[4].mxu1 %v1396_v34 }
 0x14a   : > { %1304 = vmatprep.mubr.bf16.mxu1 %v1397_v35 }
 0x151   : > { %1305 = vmatmul.mubr.bf16.gmra.mrb[8].mxu1 %v1398_v36 }
 0x214   : > { %v1294_v47 = vpop.f32.mrb[16].mxu0  ;;  %v1298_v48 = vpop.f32.mrb[0].mxu1 }
 0x215   : > { %v915_v49 = vpop.f32.mrb[17].mxu0  ;;  %v931_v50 = vpop.f32.mrb[1].mxu1  ;;  %v924_v56 = vadd.f32 %v1294_v47, %v766_v39  ;;  %v940_v17 = vadd.f32 %v1298_v48, %v786_v43 }
 0x216   : > { %v1295_v51 = vpop.f32.mrb[18].mxu0  ;;  %v1299_v52 = vpop.f32.mrb[2].mxu1  ;;  %v916_v59 = vadd.f32 %v915_v49, %v756_v37  ;;  %v932_v20 = vadd.f32 %v931_v50, %v776_v41 }
 0x217   : > { %v918_v53 = vpop.f32.mrb[19].mxu0  ;;  %v934_v54 = vpop.f32.mrb[3].mxu1  ;;  %v927_v61 = vadd.f32 %v1295_v51, %v771_v40  ;;  %v980_v1 = vmul.f32 %v924_v56, %v388_v58  ;;  %v943_v23 = vadd.f32 %v1299_v52, %v791_v44  ;;  %v984_v28 = vmul.f32 %v940_v17, %v392_v19 }
 0x218   : > { %v919_v63 = vadd.f32 %v918_v53, %v761_v38  ;;  %v978_v6 = vmul.f32 %v916_v59, %v386_v60  ;;  %v935_v26 = vadd.f32 %v934_v54, %v781_v42  ;;  %v982_v33 = vmul.f32 %v932_v20, %v390_v22 }
 0x219   : > { %v981_v9 = vmul.f32 %v927_v61, %v389_v62  ;;  %v985_v36 = vmul.f32 %v943_v23, %v393_v25 }
 0x21a   : > { %v979_v14 = vmul.f32 %v919_v63, %v387_v2  ;;  %v983_v40 = vmul.f32 %v935_v26, %v391_v29 }
 0x21c   : > { %v1302_v0 = vpop.f32.mrb[4].mxu1 }
 0x21d   : > { %v956_v3 = vadd.f32 %v1302_v0, %v806_v55  ;;  %v947_v4 = vpop.f32.mrb[5].mxu1 }
 0x21e   : > { %v948_v7 = vadd.f32 %v947_v4, %v796_v45  ;;  %v1303_v8 = vpop.f32.mrb[6].mxu1 }
 0x21f   : > { %v988_v10 = vadd.f32 %v980_v1, %v956_v3  ;;  %v959_v11 = vadd.f32 %v1303_v8, %v811_v57  ;;  %v950_v12 = vpop.f32.mrb[7].mxu1 }
 0x220   : > { %v986_v15 = vadd.f32 %v978_v6, %v948_v7  ;;  %v951_v16 = vadd.f32 %v950_v12, %v801_v46 }
 0x221   : > { %996 = vst [vmem:[%s1731_s15 + $0x10] sm:$0xff] %v988_v10  ;;  %v989_v18 = vadd.f32 %v981_v9, %v959_v11 }
 0x222   : > { %994 = vst [vmem:[%s1731_s15] sm:$0xff] %v986_v15  ;;  %v987_v21 = vadd.f32 %v979_v14, %v951_v16 }
 0x223   : > { %997 = vst [vmem:[%s1731_s15 + $0x18] sm:$0xff] %v989_v18 }
 0x224   : > { %995 = vst [vmem:[%s1731_s15 + $0x8] sm:$0xff] %v987_v21  ;;  %v1306_v27 = vpop.f32.mrb[8].mxu1 }
 0x225   : > { %v972_v30 = vadd.f32 %v1306_v27, %v826_v24  ;;  %v963_v31 = vpop.f32.mrb[9].mxu1 }
 0x226   : > { %v964_v34 = vadd.f32 %v963_v31, %v816_v5  ;;  %v1307_v35 = vpop.f32.mrb[10].mxu1  ;;  %1008 = sbr.rel (!%p1538_p6) target bundleno = 565 (0x235), region = 120 }
 0x227   : > { %v992_v37 = vadd.f32 %v984_v28, %v972_v30  ;;  %v975_v38 = vadd.f32 %v1307_v35, %v831_v32  ;;  %v966_v39 = vpop.f32.mrb[11].mxu1 }
 0x228   : > { %v990_v41 = vadd.f32 %v982_v33, %v964_v34  ;;  %v967_v42 = vadd.f32 %v966_v39, %v821_v13  ;;  %v1058_v47 = vld [vmem:[%s1731_s15 + $0x10] sm:$0xff] (%p1538_p6) }
 0x229   : > { %1000 = vst [vmem:[%s1731_s15 + $0x30] sm:$0xff] %v992_v37  ;;  %v993_v43 = vadd.f32 %v985_v36, %v975_v38  ;;  %v1054_v45 = vld [vmem:[%s1731_s15] sm:$0xff] (%p1538_p6)  ;;  %1059 = vst [vmem:[%s1012_s28 + $0x20] sm:$0xff] (%p1538_p6), %v1058_v47 }
 0x22a   : > { %998 = vst [vmem:[%s1731_s15 + $0x20] sm:$0xff] %v990_v41  ;;  %v991_v44 = vadd.f32 %v983_v40, %v967_v42  ;;  %v1060_v48 = vld [vmem:[%s1731_s15 + $0x18] sm:$0xff] (%p1538_p6)  ;;  %1055 = vst [vmem:[%s1012_s28] sm:$0xff] (%p1538_p6), %v1054_v45 }
 0x22b   : > { %1001 = vst [vmem:[%s1731_s15 + $0x38] sm:$0xff] %v993_v43  ;;  %v1056_v46 = vld [vmem:[%s1731_s15 + $0x8] sm:$0xff] (%p1538_p6)  ;;  %1061 = vst [vmem:[%s1012_s28 + $0x30] sm:$0xff] (%p1538_p6), %v1060_v48 }
 0x22c   : > { %999 = vst [vmem:[%s1731_s15 + $0x28] sm:$0xff] %v991_v44  ;;  %1057 = vst [vmem:[%s1012_s28 + $0x10] sm:$0xff] (%p1538_p6), %v1056_v46 }
 0x230   : > { %v1066_v51 = vld [vmem:[%s1731_s15 + $0x30] sm:$0xff] }
 0x231   : > { %v1062_v49 = vld [vmem:[%s1731_s15 + $0x20] sm:$0xff]  ;;  %1067 = vst [vmem:[%s1012_s28 + $0x60] sm:$0xff] %v1066_v51 }
 0x232   : > { %v1068_v52 = vld [vmem:[%s1731_s15 + $0x38] sm:$0xff]  ;;  %1063 = vst [vmem:[%s1012_s28 + $0x40] sm:$0xff] %v1062_v49 }
 0x233   : > { %v1064_v50 = vld [vmem:[%s1731_s15 + $0x28] sm:$0xff]  ;;  %1069 = vst [vmem:[%s1012_s28 + $0x70] sm:$0xff] %v1068_v52 }
 0x234   : > { %1065 = vst [vmem:[%s1012_s28 + $0x50] sm:$0xff] %v1064_v50 }
 0x235 PF: > { %s15_s24 = sadd.s32 1, %s1453_s24   ;;  %s1789_s18 = smov %s1433_s19 }
 0x236   : > { %p12_p12 = scmp.ge.s32.totalorder %s15_s24, 6   ;;  %s1790_s19 = smov %s1546_s9 }
 0x237   : > { %s1791_s20 = smov %s1445_s22  ;;  %s1792_s21 = smov %s1449_s23 }
 0x238   : > { %s1793_s22 = smov %s1796_s25  ;;  %s1794_s23 = smov %s1800_s26 }
 0x239   :  { %14 = sbr.rel (!%p12_p12) target bundleno = 4 (0x4), region = 198 }

</bundles_post_ra>
